<compile_context>
chip_gen: v7x
topology: tpu7x:2x2x1
jax: 0.10.0
libtpu: 0.0.40
codegen_flags: <defaults>
</compile_context>

<pallas_src>
import functools

import jax
import jax.numpy as jnp
import numpy as np
from jax.experimental import pallas as pl
from jax.experimental.pallas import tpu as pltpu


def _cdiv(a, b):
    return -(-a // b)


def _has_bf16_valu():
    """True on chips with native bf16 VPU lanes (v6e / v7x)."""
    try:
        kind = jax.devices()[0].device_kind.lower()
    except Exception:
        return False
    return ("v6" in kind) or ("v7" in kind)


# -----------------------------------------------------------------------------
# Pallas kernel: PairWiseInteractionLayer hot path (one batch tile per grid step)
#   x_ref  : (N, D, TB)   embeddings, batch on lanes (input dtype, e.g. bf16)
#   ww_ref : (A, D)       attention MLP weight (Linear(D, A), torch layout)
#   wb_ref : (A, 1)       attention MLP bias
#   hw_ref : (P, A)       attention projection weight (Linear(A, P), no bias)
#   ow_ref : (D, 1)       output layer weight (Linear(D, 1)), bias folded outside
#   o_ref  : (1, TB)      per-sample pair-wise logits (lane-dense)
# -----------------------------------------------------------------------------
def pairwise_attn_kernel(x_ref, ww_ref, wb_ref, hw_ref, ow_ref, o_ref, *,
                         pairs, n_fields, full_triu, mul_dtype):
    D, tb = x_ref.shape[1], x_ref.shape[2]

    def field(i):
        # per-row read + cast at point of use keeps the live vreg set small
        # (no wholesale (N, D, TB) f32 materialization -> no spills at big TB)
        return x_ref[i].astype(mul_dtype)                     # (D, tb)

    # ---- loop 1: sum over all pairs of x_i * x_j -> attn_in (D, tb), f32 acc
    if full_triu:
        # FM identity: sum_{i<j} x_i x_j = 0.5*((sum_i x_i)^2 - sum_i x_i^2)
        s = jnp.zeros((D, tb), jnp.float32)
        sq = jnp.zeros((D, tb), jnp.float32)
        for i in range(n_fields):
            xi = field(i)
            s = s + xi.astype(jnp.float32)
            sq = sq + (xi * xi).astype(jnp.float32)
        attn_in = 0.5 * (s * s - sq)
    else:
        attn_in = jnp.zeros((D, tb), jnp.float32)
        for (i, j) in pairs:
            attn_in = attn_in + (field(i) * field(j)).astype(jnp.float32)

    # ---- attention MLP: relu(W @ attn_in + b) -> scores (tiny matmuls on MXU)
    attn_temp = jnp.dot(ww_ref[...], attn_in, preferred_element_type=jnp.float32)
    attn_temp = jnp.maximum(attn_temp + wb_ref[...], 0.0)                  # (A, tb)
    scores = jnp.dot(hw_ref[...], attn_temp, preferred_element_type=jnp.float32)  # (P, tb)

    # softmax over the pair axis (axis 0) — lanes (batch) stay independent
    scores = scores - jnp.max(scores, axis=0, keepdims=True)
    e = jnp.exp(scores)
    attn_w = e * pl.reciprocal(jnp.sum(e, axis=0, keepdims=True), approx=True)

    # dropout: inference-mode identity

    # ---- loop 2: attention-weighted sum of pair products (recomputed on the
    # VPU — cheaper than storing/reloading P*(D,tb) products; f32 accumulation)
    out_x = jnp.zeros((D, tb), jnp.float32)
    for p, (i, j) in enumerate(pairs):
        out_x = out_x + attn_w[p:p + 1, :] * (field(i) * field(j)).astype(jnp.float32)

    # output projection (D -> 1): VPU multiply + sublane reduce; lane-dense store
    o_ref[...] = jnp.sum(ow_ref[...] * out_x, axis=0, keepdims=True)


def _pick_batch_tile(B, max_lane_blocks=32):
    """Batch tile (lanes): multiple of 128, up to 4096, and >=2 grid steps
    whenever the batch spans more than one lane block (v7x megacore)."""
    blocks = _cdiv(B, 128)
    if blocks <= 1:
        return 128
    n_steps = max(2, _cdiv(blocks, max_lane_blocks))
    return _cdiv(blocks, n_steps) * 128


def pairwise_interaction_pallas(x_ndb, idx_i, idx_j, W_w, W_b, h_w, out_w, out_b,
                                *, mul_dtype=None, tb=None):
    """Pair-wise attention layer.

    x_ndb: (N, D, B) embeddings already in batch-on-lanes layout (so no big
    wrapper-side transpose). Returns (B, 1) f32 logits.
    """
    N, D, B = x_ndb.shape
    pairs = tuple((int(i), int(j)) for i, j in zip(idx_i, idx_j))
    P = len(pairs)
    A = W_w.shape[0]
    assert h_w.shape == (P, A)

    # FM identity only valid for the exact full upper triangle (no duplicates)
    full_triu = (P == N * (N - 1) // 2 and
                 set(pairs) == {(i, j) for i in range(N) for j in range(i + 1, N)})

    # bf16 multiplies (with f32 accumulation) on v6e/v7x; f32 math on v5e/older
    if mul_dtype is None:
        mul_dtype = x_ndb.dtype if _has_bf16_valu() else jnp.float32

    if tb is None:
        tb = _pick_batch_tile(B)
    B_pad = _cdiv(B, tb) * tb
    if B_pad != B:
        # padded lanes are all-zero: softmax over zeros is uniform, results are
        # sliced off below -> no NaN/Inf risk
        x_ndb = jnp.pad(x_ndb, ((0, 0), (0, 0), (0, B_pad - B)))

    ww = W_w.astype(jnp.float32)                    # (A, D)
    wb = W_b.reshape(A, 1).astype(jnp.float32)      # (A, 1)
    hw = h_w.astype(jnp.float32)                    # (P, A)
    ow = out_w.reshape(D, 1).astype(jnp.float32)    # (D, 1)

    kernel = functools.partial(pairwise_attn_kernel, pairs=pairs, n_fields=N,
                               full_triu=full_triu, mul_dtype=mul_dtype)
    out = pl.pallas_call(
        kernel,
        out_shape=jax.ShapeDtypeStruct((1, B_pad), jnp.float32),
        grid=(B_pad // tb,),
        in_specs=[
            pl.BlockSpec((N, D, tb), lambda b: (0, 0, b)),   # batch-tiled, pipelined
            pl.BlockSpec((A, D), lambda b: (0, 0)),          # weights stay VMEM-resident
            pl.BlockSpec((A, 1), lambda b: (0, 0)),
            pl.BlockSpec((P, A), lambda b: (0, 0)),
            pl.BlockSpec((D, 1), lambda b: (0, 0)),
        ],
        out_specs=pl.BlockSpec((1, tb), lambda b: (0, b)),   # lane-dense output
        compiler_params=pltpu.CompilerParams(
            dimension_semantics=("parallel",),               # megacore sharding (v7x)
            vmem_limit_bytes=32 * 1024 * 1024,
        ),
    )(x_ndb, ww, wb, hw, ow)

    # output-layer bias folded here; strip batch padding, return (B, 1)
    return out[0, :B].reshape(B, 1) + out_b.reshape(1, 1).astype(jnp.float32)


# -----------------------------------------------------------------------------
# Embedding glue: build the pair-wise input DIRECTLY in (N, D, B) kernel layout
# (per review: no (B,N,D) materialization followed by a full transpose+pad)
# -----------------------------------------------------------------------------
def build_pairwise_input_ndb(params, dense_x, discrete_x, dtype=jnp.float32):
    # dense fields: Linear(1, D) applied per scalar -> (Fd, D, B)
    dense_embed_t = (dense_x.T[:, None, :]
                     * params["dense_emb_w"][:, 0][None, :, None]
                     + params["dense_emb_b"][None, :, None])
    # discrete fields: embedding gather, D on the sublane axis -> (Fs, D, B)
    disc_embed_t = jnp.stack(
        [jnp.take(tbl, discrete_x[:, i], axis=0).T
         for i, tbl in enumerate(params["disc_emb"])], axis=0)
    return jnp.concatenate([dense_embed_t.astype(dtype),
                            disc_embed_t.astype(dtype)], axis=0)       # (N, D, B)


# -----------------------------------------------------------------------------
# Parameter construction (deterministic, xavier-uniform like torch init)
# -----------------------------------------------------------------------------
def xavier_uniform(key, shape):
    fan_out, fan_in = shape[0], shape[1]
    bound = float(np.sqrt(6.0 / (fan_in + fan_out)))
    return jax.random.uniform(key, shape, jnp.float32, -bound, bound)


def init_afm_params(key, feature_dims, dense_feature_dims, embed_dim,
                    attn_factor_size):
    N = len(feature_dims) + dense_feature_dims
    P = N * (N - 1) // 2
    keys = jax.random.split(key, 6 + 2 * len(feature_dims))
    k = iter(keys)
    params = {
        # linear part
        "dense_w": xavier_uniform(next(k), (1, dense_feature_dims)),
        "dense_b": jnp.zeros((1,), jnp.float32),
        "disc_lin": [xavier_uniform(next(k), (d, 1)) for d in feature_dims],
        # embedding part
        "dense_emb_w": xavier_uniform(next(k), (embed_dim, 1)),
        "dense_emb_b": jnp.zeros((embed_dim,), jnp.float32),
        "disc_emb": [xavier_uniform(next(k), (d, embed_dim)) for d in feature_dims],
        # pair-wise interaction layer
        "W_w": xavier_uniform(next(k), (attn_factor_size, embed_dim)),
        "W_b": jnp.zeros((attn_factor_size,), jnp.float32),
        "h_w": xavier_uniform(next(k), (P, attn_factor_size)),
        "pair_out_w": xavier_uniform(next(k), (1, embed_dim)),
        "pair_out_b": jnp.zeros((1,), jnp.float32),
        # final output layer (2 -> 1)
        "out_w": xavier_uniform(next(k), (1, 2)),
        "out_b": jnp.zeros((1,), jnp.float32),
    }
    return params, N, P


# -----------------------------------------------------------------------------
# AFM forward (embedding/linear glue in plain JAX, pair-wise attention in Pallas)
# compute_dtype=bf16 by default: halves the dominant HBM stream; in-kernel math
# keeps f32 accumulation (and full-f32 multiplies on pre-v6e chips).
# -----------------------------------------------------------------------------
def afm_forward(params, dense_x, discrete_x, idx_i, idx_j,
                compute_dtype=jnp.bfloat16):
    # ----- linear part -----
    dense_out = dense_x @ params["dense_w"].T + params["dense_b"]        # (B, 1)
    disc_outs = [tbl[discrete_x[:, i]] for i, tbl in enumerate(params["disc_lin"])]
    discrete_out = jnp.sum(jnp.stack(disc_outs, axis=1), axis=1)         # (B, 1)
    linear_logits = dense_out + discrete_out                             # (B, 1)

    # ----- embedding part: built directly in the kernel's (N, D, B) layout -----
    x_ndb = build_pairwise_input_ndb(params, dense_x, discrete_x, compute_dtype)

    # ----- pair-wise attention (Pallas kernel) -----
    pair_wise_logits = pairwise_interaction_pallas(
        x_ndb, idx_i, idx_j,
        params["W_w"], params["W_b"], params["h_w"],
        params["pair_out_w"], params["pair_out_b"])                      # (B, 1)

    # ----- final combination -----
    logits = (jnp.concatenate([linear_logits, pair_wise_logits], axis=1)
              @ params["out_w"].T + params["out_b"])                     # (B, 1)
    return logits


# pure-JAX reference of the pair-wise layer (for correctness check); x: (B, N, D)
def pairwise_reference(x, idx_i, idx_j, W_w, W_b, h_w, out_w, out_b):
    xi = x[:, np.asarray(idx_i), :]
    xj = x[:, np.asarray(idx_j), :]
    pair = xi * xj
    attn_in = pair.sum(axis=1)
    attn_temp = jax.nn.relu(attn_in @ W_w.T + W_b)
    attn_w = jax.nn.softmax(attn_temp @ h_w.T, axis=-1)
    out_x = (attn_w[:, :, None] * pair).sum(axis=1)
    return out_x @ out_w.T + out_b


if __name__ == "__main__":
    # small, module-consistent shapes
    B = 8
    feature_dims = [10, 12, 8, 6]          # 4 discrete features
    dense_feature_dims = 2
    embed_dim = 16
    attn_factor_size = 8

    key = jax.random.PRNGKey(0)
    k_param, k_dense, k_disc = jax.random.split(key, 3)

    params, N, P = init_afm_params(k_param, feature_dims, dense_feature_dims,
                                   embed_dim, attn_factor_size)
    idx_i_np, idx_j_np = np.triu_indices(N, k=1)
    idx_i, idx_j = tuple(idx_i_np.tolist()), tuple(idx_j_np.tolist())

    dense_x = jax.random.normal(k_dense, (B, dense_feature_dims), jnp.float32)
    disc_keys = jax.random.split(k_disc, len(feature_dims))
    discrete_x = jnp.stack(
        [jax.random.randint(disc_keys[i], (B,), 0, d)
         for i, d in enumerate(feature_dims)], axis=1)                   # (B, 4) int32

    # full AFM forward (bf16 input path by default)
    logits = afm_forward(params, dense_x, discrete_x, idx_i, idx_j)
    logits = jax.block_until_ready(logits)
    assert logits.shape == (B, 1)

    # correctness check of the Pallas pair-wise kernel against pure JAX (f32 path,
    # forced f32 multiplies so the check is chip-independent)
    x_ndb_f32 = build_pairwise_input_ndb(params, dense_x, discrete_x, jnp.float32)
    x_bnd = jnp.transpose(x_ndb_f32, (2, 0, 1))                          # (B, N, D)

    kernel_out = pairwise_interaction_pallas(
        x_ndb_f32, idx_i, idx_j, params["W_w"], params["W_b"], params["h_w"],
        params["pair_out_w"], params["pair_out_b"], mul_dtype=jnp.float32)
    ref_out = pairwise_reference(x_bnd, idx_i_np, idx_j_np, params["W_w"],
                                 params["W_b"], params["h_w"],
                                 params["pair_out_w"], params["pair_out_b"])
    if not jnp.allclose(kernel_out, ref_out, atol=1e-2, rtol=1e-2):
        raise AssertionError("Pallas pair-wise kernel (f32) mismatch vs JAX reference")

    # bf16-input path (halves HBM traffic; bf16 VALU multiplies on v6e/v7x);
    # compare against a reference that sees the same bf16-rounded inputs.
    x_ndb_bf16 = x_ndb_f32.astype(jnp.bfloat16)
    kernel_out_bf16 = pairwise_interaction_pallas(
        x_ndb_bf16, idx_i, idx_j, params["W_w"], params["W_b"], params["h_w"],
        params["pair_out_w"], params["pair_out_b"])
    x_bnd_bf = x_bnd.astype(jnp.bfloat16).astype(jnp.float32)
    ref_out_bf = pairwise_reference(x_bnd_bf, idx_i_np, idx_j_np, params["W_w"],
                                    params["W_b"], params["h_w"],
                                    params["pair_out_w"], params["pair_out_b"])
    if not jnp.allclose(kernel_out_bf16, ref_out_bf, atol=5e-2, rtol=5e-2):
        raise AssertionError("Pallas pair-wise kernel (bf16) mismatch vs JAX reference")

    print("KERNEL_OK")
</pallas_src>

<mosaic_0001>
module attributes {stable_mosaic.version = 11 : i64} {
  func.func @pairwise_attn_kernel(%arg0: i32, %arg1: memref<6x16x128xbf16, #tpu.memory_space<vmem>>, %arg2: memref<8x16xf32, #tpu.memory_space<vmem>>, %arg3: memref<8x1xf32, #tpu.memory_space<vmem>>, %arg4: memref<15x8xf32, #tpu.memory_space<vmem>>, %arg5: memref<16x1xf32, #tpu.memory_space<vmem>>, %arg6: memref<1x128xf32, #tpu.memory_space<vmem>>) attributes {dimension_semantics = [#tpu.dimension_semantics<parallel>], iteration_bounds = array<i64: 1>, scalar_prefetch = 0 : i64, scratch_operands = 0 : i64, tpu.core_type = #tpu.core_type<tc>, window_params = [{transform_indices = @transform_0, window_bounds = array<i64: 6, 16, 128>}, {pipeline_mode = #tpu.pipeline_mode<synchronous>, transform_indices = @transform_1, window_bounds = array<i64: 8, 16>}, {pipeline_mode = #tpu.pipeline_mode<synchronous>, transform_indices = @transform_2, window_bounds = array<i64: 8, 1>}, {pipeline_mode = #tpu.pipeline_mode<synchronous>, transform_indices = @transform_3, window_bounds = array<i64: 15, 8>}, {pipeline_mode = #tpu.pipeline_mode<synchronous>, transform_indices = @transform_4, window_bounds = array<i64: 16, 1>}, {transform_indices = @transform_5, window_bounds = array<i64: 1, 128>}]} {
    %cst = arith.constant 0.000000e+00 : f32
    %0 = vector.broadcast %cst : f32 to vector<16x128xf32>
    %cst_0 = arith.constant 0.000000e+00 : f32
    %1 = vector.broadcast %cst_0 : f32 to vector<16x128xf32>
    %c0 = arith.constant 0 : index
    %c0_1 = arith.constant 0 : index
    %c0_2 = arith.constant 0 : index
    %2 = vector.load %arg1[%c0, %c0_1, %c0_2] : memref<6x16x128xbf16, #tpu.memory_space<vmem>>, vector<1x16x128xbf16>
    %3 = vector.shape_cast %2 : vector<1x16x128xbf16> to vector<16x128xbf16>
    %4 = arith.extf %3 : vector<16x128xbf16> to vector<16x128xf32>
    %5 = arith.addf %0, %4 : vector<16x128xf32>
    %6 = arith.mulf %4, %4 : vector<16x128xf32>
    %7 = arith.addf %1, %6 : vector<16x128xf32>
    %c1 = arith.constant 1 : index
    %c0_3 = arith.constant 0 : index
    %c0_4 = arith.constant 0 : index
    %8 = vector.load %arg1[%c1, %c0_3, %c0_4] : memref<6x16x128xbf16, #tpu.memory_space<vmem>>, vector<1x16x128xbf16>
    %9 = vector.shape_cast %8 : vector<1x16x128xbf16> to vector<16x128xbf16>
    %10 = arith.extf %9 : vector<16x128xbf16> to vector<16x128xf32>
    %11 = arith.addf %5, %10 : vector<16x128xf32>
    %12 = arith.mulf %10, %10 : vector<16x128xf32>
    %13 = arith.addf %7, %12 : vector<16x128xf32>
    %c2 = arith.constant 2 : index
    %c0_5 = arith.constant 0 : index
    %c0_6 = arith.constant 0 : index
    %14 = vector.load %arg1[%c2, %c0_5, %c0_6] : memref<6x16x128xbf16, #tpu.memory_space<vmem>>, vector<1x16x128xbf16>
    %15 = vector.shape_cast %14 : vector<1x16x128xbf16> to vector<16x128xbf16>
    %16 = arith.extf %15 : vector<16x128xbf16> to vector<16x128xf32>
    %17 = arith.addf %11, %16 : vector<16x128xf32>
    %18 = arith.mulf %16, %16 : vector<16x128xf32>
    %19 = arith.addf %13, %18 : vector<16x128xf32>
    %c3 = arith.constant 3 : index
    %c0_7 = arith.constant 0 : index
    %c0_8 = arith.constant 0 : index
    %20 = vector.load %arg1[%c3, %c0_7, %c0_8] : memref<6x16x128xbf16, #tpu.memory_space<vmem>>, vector<1x16x128xbf16>
    %21 = vector.shape_cast %20 : vector<1x16x128xbf16> to vector<16x128xbf16>
    %22 = arith.extf %21 : vector<16x128xbf16> to vector<16x128xf32>
    %23 = arith.addf %17, %22 : vector<16x128xf32>
    %24 = arith.mulf %22, %22 : vector<16x128xf32>
    %25 = arith.addf %19, %24 : vector<16x128xf32>
    %c4 = arith.constant 4 : index
    %c0_9 = arith.constant 0 : index
    %c0_10 = arith.constant 0 : index
    %26 = vector.load %arg1[%c4, %c0_9, %c0_10] : memref<6x16x128xbf16, #tpu.memory_space<vmem>>, vector<1x16x128xbf16>
    %27 = vector.shape_cast %26 : vector<1x16x128xbf16> to vector<16x128xbf16>
    %28 = arith.extf %27 : vector<16x128xbf16> to vector<16x128xf32>
    %29 = arith.addf %23, %28 : vector<16x128xf32>
    %30 = arith.mulf %28, %28 : vector<16x128xf32>
    %31 = arith.addf %25, %30 : vector<16x128xf32>
    %c5 = arith.constant 5 : index
    %c0_11 = arith.constant 0 : index
    %c0_12 = arith.constant 0 : index
    %32 = vector.load %arg1[%c5, %c0_11, %c0_12] : memref<6x16x128xbf16, #tpu.memory_space<vmem>>, vector<1x16x128xbf16>
    %33 = vector.shape_cast %32 : vector<1x16x128xbf16> to vector<16x128xbf16>
    %34 = arith.extf %33 : vector<16x128xbf16> to vector<16x128xf32>
    %35 = arith.addf %29, %34 : vector<16x128xf32>
    %36 = arith.mulf %34, %34 : vector<16x128xf32>
    %37 = arith.addf %31, %36 : vector<16x128xf32>
    %38 = arith.mulf %35, %35 : vector<16x128xf32>
    %39 = arith.subf %38, %37 : vector<16x128xf32>
    %cst_13 = arith.constant 5.000000e-01 : f32
    %40 = vector.broadcast %cst_13 : f32 to vector<16x128xf32>
    %41 = arith.mulf %40, %39 : vector<16x128xf32>
    %c0_14 = arith.constant 0 : index
    %c0_15 = arith.constant 0 : index
    %42 = vector.load %arg2[%c0_14, %c0_15] : memref<8x16xf32, #tpu.memory_space<vmem>>, vector<8x16xf32>
    %cst_16 = arith.constant dense<0.000000e+00> : vector<8x128xf32>
    %43 = tpu.matmul %42, %41, %cst_16 {dimension_numbers = #tpu.dot_dimension_numbers<[1], [0], [0], [1], [0, 0, 1, 1], [], []>} : vector<8x16xf32>, vector<16x128xf32>, vector<8x128xf32> -> vector<8x128xf32>
    %c0_17 = arith.constant 0 : index
    %c0_18 = arith.constant 0 : index
    %44 = vector.load %arg3[%c0_17, %c0_18] : memref<8x1xf32, #tpu.memory_space<vmem>>, vector<8x1xf32>
    %45 = vector.broadcast %44 : vector<8x1xf32> to vector<8x128xf32>
    %46 = arith.addf %43, %45 : vector<8x128xf32>
    %cst_19 = arith.constant 0.000000e+00 : f32
    %47 = vector.broadcast %cst_19 : f32 to vector<8x128xf32>
    %48 = arith.maximumf %46, %47 : vector<8x128xf32>
    %c0_20 = arith.constant 0 : index
    %c0_21 = arith.constant 0 : index
    %49 = vector.load %arg4[%c0_20, %c0_21] : memref<15x8xf32, #tpu.memory_space<vmem>>, vector<15x8xf32>
    %cst_22 = arith.constant dense<0.000000e+00> : vector<15x128xf32>
    %50 = tpu.matmul %49, %48, %cst_22 {dimension_numbers = #tpu.dot_dimension_numbers<[1], [0], [0], [1], [0, 0, 1, 1], [], []>} : vector<15x8xf32>, vector<8x128xf32>, vector<15x128xf32> -> vector<15x128xf32>
    %cst_23 = arith.constant dense<0xFF800000> : vector<128xf32>
    %51 = vector.multi_reduction <maximumf>, %50, %cst_23 [0] : vector<15x128xf32> to vector<128xf32>
    %52 = vector.shape_cast %51 : vector<128xf32> to vector<1x128xf32>
    %53 = vector.broadcast %52 : vector<1x128xf32> to vector<15x128xf32>
    %54 = arith.subf %50, %53 : vector<15x128xf32>
    %55 = math.exp %54 : vector<15x128xf32>
    %cst_24 = arith.constant dense<0.000000e+00> : vector<128xf32>
    %56 = vector.multi_reduction <add>, %55, %cst_24 [0] : vector<15x128xf32> to vector<128xf32>
    %57 = vector.shape_cast %56 : vector<128xf32> to vector<1x128xf32>
    %58 = tpu.reciprocal %57 {approx = true} : vector<1x128xf32> -> vector<1x128xf32>
    %59 = vector.broadcast %58 : vector<1x128xf32> to vector<15x128xf32>
    %60 = arith.mulf %55, %59 : vector<15x128xf32>
    %cst_25 = arith.constant 0.000000e+00 : f32
    %61 = vector.broadcast %cst_25 : f32 to vector<16x128xf32>
    %62 = vector.extract_strided_slice %60 {offsets = [0, 0], sizes = [1, 128], strides = [1, 1]} : vector<15x128xf32> to vector<1x128xf32>
    %c0_26 = arith.constant 0 : index
    %c0_27 = arith.constant 0 : index
    %c0_28 = arith.constant 0 : index
    %63 = vector.load %arg1[%c0_26, %c0_27, %c0_28] : memref<6x16x128xbf16, #tpu.memory_space<vmem>>, vector<1x16x128xbf16>
    %64 = vector.shape_cast %63 : vector<1x16x128xbf16> to vector<16x128xbf16>
    %65 = arith.extf %64 : vector<16x128xbf16> to vector<16x128xf32>
    %c1_29 = arith.constant 1 : index
    %c0_30 = arith.constant 0 : index
    %c0_31 = arith.constant 0 : index
    %66 = vector.load %arg1[%c1_29, %c0_30, %c0_31] : memref<6x16x128xbf16, #tpu.memory_space<vmem>>, vector<1x16x128xbf16>
    %67 = vector.shape_cast %66 : vector<1x16x128xbf16> to vector<16x128xbf16>
    %68 = arith.extf %67 : vector<16x128xbf16> to vector<16x128xf32>
    %69 = arith.mulf %65, %68 : vector<16x128xf32>
    %70 = vector.broadcast %62 : vector<1x128xf32> to vector<16x128xf32>
    %71 = arith.mulf %70, %69 : vector<16x128xf32>
    %72 = arith.addf %61, %71 : vector<16x128xf32>
    %73 = vector.extract_strided_slice %60 {offsets = [1, 0], sizes = [1, 128], strides = [1, 1]} : vector<15x128xf32> to vector<1x128xf32>
    %c0_32 = arith.constant 0 : index
    %c0_33 = arith.constant 0 : index
    %c0_34 = arith.constant 0 : index
    %74 = vector.load %arg1[%c0_32, %c0_33, %c0_34] : memref<6x16x128xbf16, #tpu.memory_space<vmem>>, vector<1x16x128xbf16>
    %75 = vector.shape_cast %74 : vector<1x16x128xbf16> to vector<16x128xbf16>
    %76 = arith.extf %75 : vector<16x128xbf16> to vector<16x128xf32>
    %c2_35 = arith.constant 2 : index
    %c0_36 = arith.constant 0 : index
    %c0_37 = arith.constant 0 : index
    %77 = vector.load %arg1[%c2_35, %c0_36, %c0_37] : memref<6x16x128xbf16, #tpu.memory_space<vmem>>, vector<1x16x128xbf16>
    %78 = vector.shape_cast %77 : vector<1x16x128xbf16> to vector<16x128xbf16>
    %79 = arith.extf %78 : vector<16x128xbf16> to vector<16x128xf32>
    %80 = arith.mulf %76, %79 : vector<16x128xf32>
    %81 = vector.broadcast %73 : vector<1x128xf32> to vector<16x128xf32>
    %82 = arith.mulf %81, %80 : vector<16x128xf32>
    %83 = arith.addf %72, %82 : vector<16x128xf32>
    %84 = vector.extract_strided_slice %60 {offsets = [2, 0], sizes = [1, 128], strides = [1, 1]} : vector<15x128xf32> to vector<1x128xf32>
    %c0_38 = arith.constant 0 : index
    %c0_39 = arith.constant 0 : index
    %c0_40 = arith.constant 0 : index
    %85 = vector.load %arg1[%c0_38, %c0_39, %c0_40] : memref<6x16x128xbf16, #tpu.memory_space<vmem>>, vector<1x16x128xbf16>
    %86 = vector.shape_cast %85 : vector<1x16x128xbf16> to vector<16x128xbf16>
    %87 = arith.extf %86 : vector<16x128xbf16> to vector<16x128xf32>
    %c3_41 = arith.constant 3 : index
    %c0_42 = arith.constant 0 : index
    %c0_43 = arith.constant 0 : index
    %88 = vector.load %arg1[%c3_41, %c0_42, %c0_43] : memref<6x16x128xbf16, #tpu.memory_space<vmem>>, vector<1x16x128xbf16>
    %89 = vector.shape_cast %88 : vector<1x16x128xbf16> to vector<16x128xbf16>
    %90 = arith.extf %89 : vector<16x128xbf16> to vector<16x128xf32>
    %91 = arith.mulf %87, %90 : vector<16x128xf32>
    %92 = vector.broadcast %84 : vector<1x128xf32> to vector<16x128xf32>
    %93 = arith.mulf %92, %91 : vector<16x128xf32>
    %94 = arith.addf %83, %93 : vector<16x128xf32>
    %95 = vector.extract_strided_slice %60 {offsets = [3, 0], sizes = [1, 128], strides = [1, 1]} : vector<15x128xf32> to vector<1x128xf32>
    %c0_44 = arith.constant 0 : index
    %c0_45 = arith.constant 0 : index
    %c0_46 = arith.constant 0 : index
    %96 = vector.load %arg1[%c0_44, %c0_45, %c0_46] : memref<6x16x128xbf16, #tpu.memory_space<vmem>>, vector<1x16x128xbf16>
    %97 = vector.shape_cast %96 : vector<1x16x128xbf16> to vector<16x128xbf16>
    %98 = arith.extf %97 : vector<16x128xbf16> to vector<16x128xf32>
    %c4_47 = arith.constant 4 : index
    %c0_48 = arith.constant 0 : index
    %c0_49 = arith.constant 0 : index
    %99 = vector.load %arg1[%c4_47, %c0_48, %c0_49] : memref<6x16x128xbf16, #tpu.memory_space<vmem>>, vector<1x16x128xbf16>
    %100 = vector.shape_cast %99 : vector<1x16x128xbf16> to vector<16x128xbf16>
    %101 = arith.extf %100 : vector<16x128xbf16> to vector<16x128xf32>
    %102 = arith.mulf %98, %101 : vector<16x128xf32>
    %103 = vector.broadcast %95 : vector<1x128xf32> to vector<16x128xf32>
    %104 = arith.mulf %103, %102 : vector<16x128xf32>
    %105 = arith.addf %94, %104 : vector<16x128xf32>
    %106 = vector.extract_strided_slice %60 {offsets = [4, 0], sizes = [1, 128], strides = [1, 1]} : vector<15x128xf32> to vector<1x128xf32>
    %c0_50 = arith.constant 0 : index
    %c0_51 = arith.constant 0 : index
    %c0_52 = arith.constant 0 : index
    %107 = vector.load %arg1[%c0_50, %c0_51, %c0_52] : memref<6x16x128xbf16, #tpu.memory_space<vmem>>, vector<1x16x128xbf16>
    %108 = vector.shape_cast %107 : vector<1x16x128xbf16> to vector<16x128xbf16>
    %109 = arith.extf %108 : vector<16x128xbf16> to vector<16x128xf32>
    %c5_53 = arith.constant 5 : index
    %c0_54 = arith.constant 0 : index
    %c0_55 = arith.constant 0 : index
    %110 = vector.load %arg1[%c5_53, %c0_54, %c0_55] : memref<6x16x128xbf16, #tpu.memory_space<vmem>>, vector<1x16x128xbf16>
    %111 = vector.shape_cast %110 : vector<1x16x128xbf16> to vector<16x128xbf16>
    %112 = arith.extf %111 : vector<16x128xbf16> to vector<16x128xf32>
    %113 = arith.mulf %109, %112 : vector<16x128xf32>
    %114 = vector.broadcast %106 : vector<1x128xf32> to vector<16x128xf32>
    %115 = arith.mulf %114, %113 : vector<16x128xf32>
    %116 = arith.addf %105, %115 : vector<16x128xf32>
    %117 = vector.extract_strided_slice %60 {offsets = [5, 0], sizes = [1, 128], strides = [1, 1]} : vector<15x128xf32> to vector<1x128xf32>
    %c1_56 = arith.constant 1 : index
    %c0_57 = arith.constant 0 : index
    %c0_58 = arith.constant 0 : index
    %118 = vector.load %arg1[%c1_56, %c0_57, %c0_58] : memref<6x16x128xbf16, #tpu.memory_space<vmem>>, vector<1x16x128xbf16>
    %119 = vector.shape_cast %118 : vector<1x16x128xbf16> to vector<16x128xbf16>
    %120 = arith.extf %119 : vector<16x128xbf16> to vector<16x128xf32>
    %c2_59 = arith.constant 2 : index
    %c0_60 = arith.constant 0 : index
    %c0_61 = arith.constant 0 : index
    %121 = vector.load %arg1[%c2_59, %c0_60, %c0_61] : memref<6x16x128xbf16, #tpu.memory_space<vmem>>, vector<1x16x128xbf16>
    %122 = vector.shape_cast %121 : vector<1x16x128xbf16> to vector<16x128xbf16>
    %123 = arith.extf %122 : vector<16x128xbf16> to vector<16x128xf32>
    %124 = arith.mulf %120, %123 : vector<16x128xf32>
    %125 = vector.broadcast %117 : vector<1x128xf32> to vector<16x128xf32>
    %126 = arith.mulf %125, %124 : vector<16x128xf32>
    %127 = arith.addf %116, %126 : vector<16x128xf32>
    %128 = vector.extract_strided_slice %60 {offsets = [6, 0], sizes = [1, 128], strides = [1, 1]} : vector<15x128xf32> to vector<1x128xf32>
    %c1_62 = arith.constant 1 : index
    %c0_63 = arith.constant 0 : index
    %c0_64 = arith.constant 0 : index
    %129 = vector.load %arg1[%c1_62, %c0_63, %c0_64] : memref<6x16x128xbf16, #tpu.memory_space<vmem>>, vector<1x16x128xbf16>
    %130 = vector.shape_cast %129 : vector<1x16x128xbf16> to vector<16x128xbf16>
    %131 = arith.extf %130 : vector<16x128xbf16> to vector<16x128xf32>
    %c3_65 = arith.constant 3 : index
    %c0_66 = arith.constant 0 : index
    %c0_67 = arith.constant 0 : index
    %132 = vector.load %arg1[%c3_65, %c0_66, %c0_67] : memref<6x16x128xbf16, #tpu.memory_space<vmem>>, vector<1x16x128xbf16>
    %133 = vector.shape_cast %132 : vector<1x16x128xbf16> to vector<16x128xbf16>
    %134 = arith.extf %133 : vector<16x128xbf16> to vector<16x128xf32>
    %135 = arith.mulf %131, %134 : vector<16x128xf32>
    %136 = vector.broadcast %128 : vector<1x128xf32> to vector<16x128xf32>
    %137 = arith.mulf %136, %135 : vector<16x128xf32>
    %138 = arith.addf %127, %137 : vector<16x128xf32>
    %139 = vector.extract_strided_slice %60 {offsets = [7, 0], sizes = [1, 128], strides = [1, 1]} : vector<15x128xf32> to vector<1x128xf32>
    %c1_68 = arith.constant 1 : index
    %c0_69 = arith.constant 0 : index
    %c0_70 = arith.constant 0 : index
    %140 = vector.load %arg1[%c1_68, %c0_69, %c0_70] : memref<6x16x128xbf16, #tpu.memory_space<vmem>>, vector<1x16x128xbf16>
    %141 = vector.shape_cast %140 : vector<1x16x128xbf16> to vector<16x128xbf16>
    %142 = arith.extf %141 : vector<16x128xbf16> to vector<16x128xf32>
    %c4_71 = arith.constant 4 : index
    %c0_72 = arith.constant 0 : index
    %c0_73 = arith.constant 0 : index
    %143 = vector.load %arg1[%c4_71, %c0_72, %c0_73] : memref<6x16x128xbf16, #tpu.memory_space<vmem>>, vector<1x16x128xbf16>
    %144 = vector.shape_cast %143 : vector<1x16x128xbf16> to vector<16x128xbf16>
    %145 = arith.extf %144 : vector<16x128xbf16> to vector<16x128xf32>
    %146 = arith.mulf %142, %145 : vector<16x128xf32>
    %147 = vector.broadcast %139 : vector<1x128xf32> to vector<16x128xf32>
    %148 = arith.mulf %147, %146 : vector<16x128xf32>
    %149 = arith.addf %138, %148 : vector<16x128xf32>
    %150 = vector.extract_strided_slice %60 {offsets = [8, 0], sizes = [1, 128], strides = [1, 1]} : vector<15x128xf32> to vector<1x128xf32>
    %c1_74 = arith.constant 1 : index
    %c0_75 = arith.constant 0 : index
    %c0_76 = arith.constant 0 : index
    %151 = vector.load %arg1[%c1_74, %c0_75, %c0_76] : memref<6x16x128xbf16, #tpu.memory_space<vmem>>, vector<1x16x128xbf16>
    %152 = vector.shape_cast %151 : vector<1x16x128xbf16> to vector<16x128xbf16>
    %153 = arith.extf %152 : vector<16x128xbf16> to vector<16x128xf32>
    %c5_77 = arith.constant 5 : index
    %c0_78 = arith.constant 0 : index
    %c0_79 = arith.constant 0 : index
    %154 = vector.load %arg1[%c5_77, %c0_78, %c0_79] : memref<6x16x128xbf16, #tpu.memory_space<vmem>>, vector<1x16x128xbf16>
    %155 = vector.shape_cast %154 : vector<1x16x128xbf16> to vector<16x128xbf16>
    %156 = arith.extf %155 : vector<16x128xbf16> to vector<16x128xf32>
    %157 = arith.mulf %153, %156 : vector<16x128xf32>
    %158 = vector.broadcast %150 : vector<1x128xf32> to vector<16x128xf32>
    %159 = arith.mulf %158, %157 : vector<16x128xf32>
    %160 = arith.addf %149, %159 : vector<16x128xf32>
    %161 = vector.extract_strided_slice %60 {offsets = [9, 0], sizes = [1, 128], strides = [1, 1]} : vector<15x128xf32> to vector<1x128xf32>
    %c2_80 = arith.constant 2 : index
    %c0_81 = arith.constant 0 : index
    %c0_82 = arith.constant 0 : index
    %162 = vector.load %arg1[%c2_80, %c0_81, %c0_82] : memref<6x16x128xbf16, #tpu.memory_space<vmem>>, vector<1x16x128xbf16>
    %163 = vector.shape_cast %162 : vector<1x16x128xbf16> to vector<16x128xbf16>
    %164 = arith.extf %163 : vector<16x128xbf16> to vector<16x128xf32>
    %c3_83 = arith.constant 3 : index
    %c0_84 = arith.constant 0 : index
    %c0_85 = arith.constant 0 : index
    %165 = vector.load %arg1[%c3_83, %c0_84, %c0_85] : memref<6x16x128xbf16, #tpu.memory_space<vmem>>, vector<1x16x128xbf16>
    %166 = vector.shape_cast %165 : vector<1x16x128xbf16> to vector<16x128xbf16>
    %167 = arith.extf %166 : vector<16x128xbf16> to vector<16x128xf32>
    %168 = arith.mulf %164, %167 : vector<16x128xf32>
    %169 = vector.broadcast %161 : vector<1x128xf32> to vector<16x128xf32>
    %170 = arith.mulf %169, %168 : vector<16x128xf32>
    %171 = arith.addf %160, %170 : vector<16x128xf32>
    %172 = vector.extract_strided_slice %60 {offsets = [10, 0], sizes = [1, 128], strides = [1, 1]} : vector<15x128xf32> to vector<1x128xf32>
    %c2_86 = arith.constant 2 : index
    %c0_87 = arith.constant 0 : index
    %c0_88 = arith.constant 0 : index
    %173 = vector.load %arg1[%c2_86, %c0_87, %c0_88] : memref<6x16x128xbf16, #tpu.memory_space<vmem>>, vector<1x16x128xbf16>
    %174 = vector.shape_cast %173 : vector<1x16x128xbf16> to vector<16x128xbf16>
    %175 = arith.extf %174 : vector<16x128xbf16> to vector<16x128xf32>
    %c4_89 = arith.constant 4 : index
    %c0_90 = arith.constant 0 : index
    %c0_91 = arith.constant 0 : index
    %176 = vector.load %arg1[%c4_89, %c0_90, %c0_91] : memref<6x16x128xbf16, #tpu.memory_space<vmem>>, vector<1x16x128xbf16>
    %177 = vector.shape_cast %176 : vector<1x16x128xbf16> to vector<16x128xbf16>
    %178 = arith.extf %177 : vector<16x128xbf16> to vector<16x128xf32>
    %179 = arith.mulf %175, %178 : vector<16x128xf32>
    %180 = vector.broadcast %172 : vector<1x128xf32> to vector<16x128xf32>
    %181 = arith.mulf %180, %179 : vector<16x128xf32>
    %182 = arith.addf %171, %181 : vector<16x128xf32>
    %183 = vector.extract_strided_slice %60 {offsets = [11, 0], sizes = [1, 128], strides = [1, 1]} : vector<15x128xf32> to vector<1x128xf32>
    %c2_92 = arith.constant 2 : index
    %c0_93 = arith.constant 0 : index
    %c0_94 = arith.constant 0 : index
    %184 = vector.load %arg1[%c2_92, %c0_93, %c0_94] : memref<6x16x128xbf16, #tpu.memory_space<vmem>>, vector<1x16x128xbf16>
    %185 = vector.shape_cast %184 : vector<1x16x128xbf16> to vector<16x128xbf16>
    %186 = arith.extf %185 : vector<16x128xbf16> to vector<16x128xf32>
    %c5_95 = arith.constant 5 : index
    %c0_96 = arith.constant 0 : index
    %c0_97 = arith.constant 0 : index
    %187 = vector.load %arg1[%c5_95, %c0_96, %c0_97] : memref<6x16x128xbf16, #tpu.memory_space<vmem>>, vector<1x16x128xbf16>
    %188 = vector.shape_cast %187 : vector<1x16x128xbf16> to vector<16x128xbf16>
    %189 = arith.extf %188 : vector<16x128xbf16> to vector<16x128xf32>
    %190 = arith.mulf %186, %189 : vector<16x128xf32>
    %191 = vector.broadcast %183 : vector<1x128xf32> to vector<16x128xf32>
    %192 = arith.mulf %191, %190 : vector<16x128xf32>
    %193 = arith.addf %182, %192 : vector<16x128xf32>
    %194 = vector.extract_strided_slice %60 {offsets = [12, 0], sizes = [1, 128], strides = [1, 1]} : vector<15x128xf32> to vector<1x128xf32>
    %c3_98 = arith.constant 3 : index
    %c0_99 = arith.constant 0 : index
    %c0_100 = arith.constant 0 : index
    %195 = vector.load %arg1[%c3_98, %c0_99, %c0_100] : memref<6x16x128xbf16, #tpu.memory_space<vmem>>, vector<1x16x128xbf16>
    %196 = vector.shape_cast %195 : vector<1x16x128xbf16> to vector<16x128xbf16>
    %197 = arith.extf %196 : vector<16x128xbf16> to vector<16x128xf32>
    %c4_101 = arith.constant 4 : index
    %c0_102 = arith.constant 0 : index
    %c0_103 = arith.constant 0 : index
    %198 = vector.load %arg1[%c4_101, %c0_102, %c0_103] : memref<6x16x128xbf16, #tpu.memory_space<vmem>>, vector<1x16x128xbf16>
    %199 = vector.shape_cast %198 : vector<1x16x128xbf16> to vector<16x128xbf16>
    %200 = arith.extf %199 : vector<16x128xbf16> to vector<16x128xf32>
    %201 = arith.mulf %197, %200 : vector<16x128xf32>
    %202 = vector.broadcast %194 : vector<1x128xf32> to vector<16x128xf32>
    %203 = arith.mulf %202, %201 : vector<16x128xf32>
    %204 = arith.addf %193, %203 : vector<16x128xf32>
    %205 = vector.extract_strided_slice %60 {offsets = [13, 0], sizes = [1, 128], strides = [1, 1]} : vector<15x128xf32> to vector<1x128xf32>
    %c3_104 = arith.constant 3 : index
    %c0_105 = arith.constant 0 : index
    %c0_106 = arith.constant 0 : index
    %206 = vector.load %arg1[%c3_104, %c0_105, %c0_106] : memref<6x16x128xbf16, #tpu.memory_space<vmem>>, vector<1x16x128xbf16>
    %207 = vector.shape_cast %206 : vector<1x16x128xbf16> to vector<16x128xbf16>
    %208 = arith.extf %207 : vector<16x128xbf16> to vector<16x128xf32>
    %c5_107 = arith.constant 5 : index
    %c0_108 = arith.constant 0 : index
    %c0_109 = arith.constant 0 : index
    %209 = vector.load %arg1[%c5_107, %c0_108, %c0_109] : memref<6x16x128xbf16, #tpu.memory_space<vmem>>, vector<1x16x128xbf16>
    %210 = vector.shape_cast %209 : vector<1x16x128xbf16> to vector<16x128xbf16>
    %211 = arith.extf %210 : vector<16x128xbf16> to vector<16x128xf32>
    %212 = arith.mulf %208, %211 : vector<16x128xf32>
    %213 = vector.broadcast %205 : vector<1x128xf32> to vector<16x128xf32>
    %214 = arith.mulf %213, %212 : vector<16x128xf32>
    %215 = arith.addf %204, %214 : vector<16x128xf32>
    %216 = vector.extract_strided_slice %60 {offsets = [14, 0], sizes = [1, 128], strides = [1, 1]} : vector<15x128xf32> to vector<1x128xf32>
    %c4_110 = arith.constant 4 : index
    %c0_111 = arith.constant 0 : index
    %c0_112 = arith.constant 0 : index
    %217 = vector.load %arg1[%c4_110, %c0_111, %c0_112] : memref<6x16x128xbf16, #tpu.memory_space<vmem>>, vector<1x16x128xbf16>
    %218 = vector.shape_cast %217 : vector<1x16x128xbf16> to vector<16x128xbf16>
    %219 = arith.extf %218 : vector<16x128xbf16> to vector<16x128xf32>
    %c5_113 = arith.constant 5 : index
    %c0_114 = arith.constant 0 : index
    %c0_115 = arith.constant 0 : index
    %220 = vector.load %arg1[%c5_113, %c0_114, %c0_115] : memref<6x16x128xbf16, #tpu.memory_space<vmem>>, vector<1x16x128xbf16>
    %221 = vector.shape_cast %220 : vector<1x16x128xbf16> to vector<16x128xbf16>
    %222 = arith.extf %221 : vector<16x128xbf16> to vector<16x128xf32>
    %223 = arith.mulf %219, %222 : vector<16x128xf32>
    %224 = vector.broadcast %216 : vector<1x128xf32> to vector<16x128xf32>
    %225 = arith.mulf %224, %223 : vector<16x128xf32>
    %226 = arith.addf %215, %225 : vector<16x128xf32>
    %c0_116 = arith.constant 0 : index
    %c0_117 = arith.constant 0 : index
    %227 = vector.load %arg5[%c0_116, %c0_117] : memref<16x1xf32, #tpu.memory_space<vmem>>, vector<16x1xf32>
    %228 = vector.broadcast %227 : vector<16x1xf32> to vector<16x128xf32>
    %229 = arith.mulf %228, %226 : vector<16x128xf32>
    %cst_118 = arith.constant dense<0.000000e+00> : vector<128xf32>
    %230 = vector.multi_reduction <add>, %229, %cst_118 [0] : vector<16x128xf32> to vector<128xf32>
    %231 = vector.shape_cast %230 : vector<128xf32> to vector<1x128xf32>
    %c0_119 = arith.constant 0 : index
    %c0_120 = arith.constant 0 : index
    %232 = vector.load %arg6[%c0_119, %c0_120] : memref<1x128xf32, #tpu.memory_space<vmem>>, vector<1x128xf32>
    tpu.vector_store %arg6[%c0_119, %c0_120], %231 {strides = array<i32>} : memref<1x128xf32, #tpu.memory_space<vmem>>, vector<1x128xf32>,
    return
  }
  func.func @transform_0(%arg0: i32) -> (i32, i32, i32) {
    %c0_i32 = arith.constant 0 : i32
    %c0_i32_0 = arith.constant 0 : i32
    %c0_i32_1 = arith.constant 0 : i32
    return %c0_i32, %c0_i32_0, %arg0 : i32, i32, i32
  }
  func.func @transform_1(%arg0: i32) -> (i32, i32) {
    %c0_i32 = arith.constant 0 : i32
    %c0_i32_0 = arith.constant 0 : i32
    %c0_i32_1 = arith.constant 0 : i32
    return %c0_i32, %c0_i32_0 : i32, i32
  }
  func.func @transform_2(%arg0: i32) -> (i32, i32) {
    %c0_i32 = arith.constant 0 : i32
    %c0_i32_0 = arith.constant 0 : i32
    %c0_i32_1 = arith.constant 0 : i32
    return %c0_i32, %c0_i32_0 : i32, i32
  }
  func.func @transform_3(%arg0: i32) -> (i32, i32) {
    %c0_i32 = arith.constant 0 : i32
    %c0_i32_0 = arith.constant 0 : i32
    %c0_i32_1 = arith.constant 0 : i32
    return %c0_i32, %c0_i32_0 : i32, i32
  }
  func.func @transform_4(%arg0: i32) -> (i32, i32) {
    %c0_i32 = arith.constant 0 : i32
    %c0_i32_0 = arith.constant 0 : i32
    %c0_i32_1 = arith.constant 0 : i32
    return %c0_i32, %c0_i32_0 : i32, i32
  }
  func.func @transform_5(%arg0: i32) -> (i32, i32) {
    %c0_i32 = arith.constant 0 : i32
    %c0_i32_0 = arith.constant 0 : i32
    return %c0_i32, %arg0 : i32, i32
  }
}

</mosaic_0001>

<bundles_post_ra>
// kernel: tpu_custom_call.1
= control target key start
LH: loop header
LB: loop body
LE: loop exit
PB: predicated region body
PF: predicated region fallthrough
CT: control target
= control target key end

     0   :  { %10 = vsyncpa [#allocation3], 0  ;;  %s866_s0 = inlined_call_operand.vmem [shape: bf16[6,16,128], index: 0, kind: input, shape index: {}]   ;;  %s867_s1 = inlined_call_operand.hbm [shape: f32[8,16], index: 1, kind: input, shape index: {}]   ;;  %s868_s2 = inlined_call_operand.vmem [shape: f32[8,1], index: 2, kind: input, shape index: {}]   ;;  %s869_s3 = inlined_call_operand.vmem [shape: f32[15,8], index: 3, kind: input, shape index: {}]   ;;  %s870_s4 = inlined_call_operand.vmem [shape: f32[16,1], index: 4, kind: input, shape index: {}]   ;;  %s871_s5 = inlined_call_operand.hbm [shape: f32[1,128], index: 5, kind: output, shape index: {}]  }
   0x1   :  { %11 = vsyncpa [#allocation4], 0  ;;  %s630_s18 = smov [#allocation2]   ;;  %s560_s22 = scalar_lea.hbm %s867_s1, 128 }
   0x2   :  { %s20_s19 = sshll.u32 %s630_s18, 4  ;;  %p561_p0 = scmp.ne.s32.totalorder %s867_s1, %s560_s22  ;;  %s21_s19 = int_to_ptr.vmem [resolvable:$true] %s20_s19 }
   0x3   :  { %p564_p1 = scmp.lt.u32.totalorder %s560_s22, %s867_s1 }
   0x5   :  { %p566_p2 = pnand %p564_p1, %p561_p0 }
   0x7   :  { %569 = shalt.err (!%p566_p2)
}
   0x8   :  { %s570_s27 = scalar_lea.vmem %s21_s19, 128  ;;  %p575_p4 = scmp.lt.s32.totalorder %s21_s19, %s21_s19 }
   0x9   :  { %p571_p3 = scmp.ne.s32.totalorder %s21_s19, %s570_s27  ;;  %p576_p5 = scmp.lt.s32.totalorder %s570_s27, %s570_s27 }
   0xb   :  { %p577_p6 = por %p576_p5, %p575_p4 }
   0xd   :  { %p578_p7 = pnand %p577_p6, %p571_p3 }
   0xf   :  { %581 = shalt.err (!%p578_p7)
}
  0x10   :  { %23 = dma.hbm_to_vmem [thread:$0]  %s867_s1, 128, %s21_s19, [#allocation3]  }
  0x11   :  { %604 = dma.done.wait [#allocation3], 128  }
  0x12   :  { %605 = vsyncadd [#allocation3], 4294967168  ;;  %v631_v0 = vmov 0.0|0.0   ;;  %vm632_vm0 = vmmov 0   ;;  %v633_v1 = vmov 0.0   ;;  %v634_v2 = vmov 0  }
  0x13   :  { %543 = vmatprep.subr.bf16.mxu0 %v631_v0  ;;  %535 = vmatprep.mubr.msk.f32.mxu0 %vm632_vm0, %v633_v1  ;;  %v497_v3 = vld [vmem:[%s866_s0] sm:$0xff]   ;;  %v520_v4 = vld [vmem:[%s866_s0 + $0x8] sm:$0xff]   ;;  %v521_v5 = vld [vmem:[%s866_s0 + $0x10] sm:$0xff]   ;;  %v635_v39 = vmov 1935823168   ;;  %v620_v42 = vlaneseq  ;;  %vm111_vm1 = vcmask 130048  }
  0x14   :  { %552 = vset.pattern.permute.xlu0 %v634_v2  ;;  %553 = vset.pattern.permute.xlu1 %v634_v2  ;;  %v688_v6 = vunpack.c.l.bf16 %v497_v3  ;;  %v690_v7 = vunpack.c.h.bf16 %v497_v3  ;;  %v692_v8 = vunpack.c.l.bf16 %v520_v4  ;;  %v694_v9 = vunpack.c.h.bf16 %v520_v4  ;;  %v522_v10 = vld [vmem:[%s866_s0 + $0x18] sm:$0xff]   ;;  %v105_v15 = vld [vmem:[%s868_s2] sm:$0xff]  ;;  %v524_v19 = vld [vmem:[%s866_s0 + $0x28] sm:$0xff]  }
  0x15   :  { %v699_v11 = vunpack.c.l.bf16 %v521_v5  ;;  %v701_v12 = vunpack.c.h.bf16 %v521_v5  ;;  %v703_v13 = vunpack.c.l.bf16 %v522_v10  ;;  %v705_v14 = vunpack.c.h.bf16 %v522_v10  ;;  %v523_v18 = vld [vmem:[%s866_s0 + $0x20] sm:$0xff]   ;;  %108 = vperm.xlu0 %552, %v105_v15   ;;  %v447_v54 = vld [vmem:[%s870_s4 + $0x8] sm:$0xff] }
  0x16   :  { %v48_v16 = vadd.f32 %v692_v8, %v688_v6  ;;  %v49_v17 = vadd.f32 %v694_v9, %v690_v7  ;;  %v446_v20 = vld [vmem:[%s870_s4] sm:$0xff]  ;;  %608 = vmul.bf16.f32.vacc0 %v497_v3, %v497_v3  ;;  %v725_v23 = vunpack.c.l.bf16 %v523_v18  ;;  %455 = vperm.xlu1 %553, %v447_v54   ;;  %v187_v60 = vld [vmem:[%s869_s3 + $0x8] sm:$0x7f] }
  0x17   :  { %609 = vmac.bf16.f32.vacc0 %v520_v4, %v520_v4  ;;  %v727_v24 = vunpack.c.h.bf16 %v523_v18  ;;  %v731_v27 = vunpack.c.l.bf16 %v524_v19  ;;  %v733_v28 = vunpack.c.h.bf16 %v524_v19  ;;  %v104_v52 = vld [vmem:[#allocation2] sm:$0xff] }
  0x18   :  { %v59_v21 = vadd.f32 %v699_v11, %v48_v16  ;;  %v60_v22 = vadd.f32 %v701_v12, %v49_v17  ;;  %610 = vmac.bf16.f32.vacc0 %v521_v5, %v521_v5  ;;  %v618_v40 = vunpack.c.l.s4 %v635_v39  ;;  %v186_v53 = vld [vmem:[%s869_s3] sm:$0xff]  ;;  %s636_s3 = smov [#allocation5]  }
  0x19   :  { %450 = vperm.xlu0 %552, %v446_v20   ;;  %611 = vmac.bf16.f32.vacc0 %v522_v10, %v522_v10  ;;  %v739_v43 = vshrl.u32 %v620_v42, 7  ;;  %vm188_vm2 = vcmask 64512   ;;  %vm270_vm3 = vcmask 1046528   ;;  %s474_s4 = sshll.u32 %s636_s3, 4  ;;  %s475_s4 = int_to_ptr.vmem [resolvable:$true] %s474_s4 }
  0x1a   :  { %v70_v25 = vadd.f32 %v703_v13, %v59_v21  ;;  %v71_v26 = vadd.f32 %v705_v14, %v60_v22  ;;  %612 = vmac.bf16.f32.vacc0 %v523_v18, %v523_v18  ;;  %v619_v41 = vunpack.c.0.s8 %v618_v40  ;;  %540 = vmatprep.mubr.msk.f32.mxu1 %vm188_vm2, %v186_v53  ;;  %s582_s24 = scalar_lea.vmem %s475_s4, 16  ;;  %s586_s25 = scalar_lea.vmem %s475_s4, 32 }
  0x1b   :  { %613 = vmac.bf16.f32.vacc0 %v524_v19, %v524_v19  ;;  %v297_v39 = vmul.f32 %v694_v9, %v690_v7  ;;  %v306_v42 = vmul.f32 %v699_v11, %v688_v6  ;;  %v327_v53 = vmul.f32 %v727_v24, %v690_v7  ;;  %p583_p8 = scmp.ne.s32.totalorder %s475_s4, %s582_s24  ;;  %p587_p9 = scmp.lt.s32.totalorder %s475_s4, %s475_s4 }
  0x1c   :  { %v81_v29 = vadd.f32 %v725_v23, %v70_v25  ;;  %v82_v30 = vadd.f32 %v727_v24, %v71_v26  ;;  %v622_v44 = vsub.s32 %v619_v41, %v739_v43  ;;  %p588_p10 = scmp.lt.s32.totalorder %s586_s25, %s582_s24 }
  0x1d   :  { %v614_v35 = vmovacc.add.low.vacc0 }
  0x1e   :  { %v92_v31 = vadd.f32 %v731_v27, %v81_v29  ;;  %v93_v32 = vadd.f32 %v733_v28, %v82_v30  ;;  %v615_v36 = vmovacc.add.high.vacc0  ;;  %p589_p11 = por %p588_p10, %p587_p9 }
  0x20   :  { %v98_v33 = vmul.f32 %v92_v31, %v92_v31  ;;  %v99_v34 = vmul.f32 %v93_v32, %v93_v32  ;;  %v616_v37 = vcombine.low %v614_v35, %v615_v36  ;;  %v617_v38 = vcombine.high %v614_v35, %v615_v36  ;;  %p590_p12 = pnand %p589_p11, %p583_p8 }
  0x21   :  { %v320_v35 = vsub.s32 2, %v739_v43 }
  0x22   :  { %v623_v45 = vrot.slane %v616_v37, %v622_v44  ;;  %v629_v46 = vrot.slane %v617_v38, %v622_v44  ;;  %v330_v37 = vsub.s32 3, %v739_v43  ;;  %v296_v38 = vmul.f32 %v692_v8, %v688_v6 }
  0x23   :  { %v307_v44 = vmul.f32 %v701_v12, %v690_v7 }
  0x24   :  { %v100_v47 = vsub.f32 %v98_v33, %v623_v45  ;;  %v101_v48 = vsub.f32 %v99_v34, %v629_v46  ;;  %v300_v33 = vsub.s32 0, %v739_v43  ;;  %v310_v34 = vsub.s32 1, %v739_v43 }
  0x25   :  { %v340_v45 = vsub.s32 4, %v739_v43  ;;  %v316_v46 = vmul.f32 %v703_v13, %v688_v6 }
  0x26   :  { %v102_v49 = vmul.f32 0.5, %v100_v47  ;;  %v103_v50 = vmul.f32 0.5, %v101_v48 }
  0x28   :  { %v544_v51 = vpack.c.bf16 %v103_v50, %v102_v49  ;;  %v317_v49 = vmul.f32 %v705_v14, %v690_v7 }
  0x2a   :  { %545 = vmatpush3.bf16.msra.mxu0 %v544_v51  ;;  %v350_v51 = vsub.s32 5, %v739_v43 }
  0x2d   :  { %536 = vmatmul.mubr.msk.f32.vlgmr.msra.gmra.mrb[0].mxu0 %vm111_vm1, %v104_v52  ;;  %v326_v52 = vmul.f32 %v725_v23, %v688_v6 }
  0x94   :  { %v109_v55 = vpop.permute.xlu0 %108 }
 0x100   :  { %v181_v56 = vpop.f32.mrb[0].mxu0 }
 0x101   :  { %v182_v57 = vadd.f32 %v181_v56, %v109_v55  ;;  %v537_v58 = vpop.f32.mrb[1].mxu0 }
 0x103   :  { %v185_v59 = vmax.f32 %v182_v57, 0.0 }
 0x105   :  { %538 = vmatprep.subr.mxu1 %v185_v59 }
 0x106   :  { %539 = vmatpush3.msra.mxu1 %v185_v59  ;;  %v360_v59 = vsub.s32 6, %v739_v43 }
 0x107   :  { %541 = vmatmul.mubr.msk.f32.vlgmr.msra.gmra.mrb[0].mxu1 %vm188_vm2, %v187_v60  ;;  %v336_v60 = vmul.f32 %v731_v27, %v688_v6 }
 0x1da   :  { %v542_v61 = vpop.f32.mrb[0].mxu1 }
 0x1db   :  { %v261_v62 = vpop.f32.mrb[1].mxu1  ;;  %v271_v63 = vsel %vm270_vm3, %v542_v61, -inf }
 0x1dc   :  { %v272_v0 = vmax.f32 %v261_v62, %v271_v63 }
 0x1de   :  { %v273_v1 = vrot.slane %v272_v0, 4 }
 0x1e0   :  { %v274_v2 = vmax.f32 %v272_v0, %v273_v1 }
 0x1e2   :  { %v275_v3 = vrot.slane %v274_v2, 2 }
 0x1e4   :  { %v276_v4 = vmax.f32 %v274_v2, %v275_v3  ;;  %v370_v3 = vsub.s32 7, %v739_v43 }
 0x1e6   :  { %v277_v5 = vrot.slane %v276_v4, 1 }
 0x1e8   :  { %v278_v10 = vmax.f32 %v276_v4, %v277_v5  ;;  %v346_v4 = vmul.f32 %v699_v11, %v692_v8  ;;  %v347_v5 = vmul.f32 %v701_v12, %v694_v9 }
 0x1ea   :  { %v279_v15 = vsub.f32 %v261_v62, %v278_v10  ;;  %v280_v16 = vsub.f32 %v542_v61, %v278_v10  ;;  %v337_v61 = vmul.f32 %v733_v28, %v690_v7 }
 0x1ec   :  { %v281_v17 = vmul.f32 1.442695, %v279_v15  ;;  %v283_v18 = vmul.f32 1.442695, %v280_v16 }
 0x1ee   :  { %554 = vpow2.f32 %v281_v17  ;;  %v356_v17 = vmul.f32 %v703_v13, %v692_v8 }
 0x1ef   :  { %556 = vpow2.f32 %v283_v18  ;;  %v357_v18 = vmul.f32 %v705_v14, %v694_v9 }
 0x1f8   :  { %v555_v19 = vpop.eup %554 }
 0x1f9   :  { %v557_v20 = vpop.eup %556 }
 0x1fa   :  { %v285_v21 = vsel %vm270_vm3, %v557_v20, 0.0 }
 0x1fb   :  { %v286_v22 = vadd.f32 %v555_v19, %v285_v21 }
 0x1fd   :  { %v287_v25 = vrot.slane %v286_v22, 4 }
 0x1ff   :  { %v288_v26 = vadd.f32 %v287_v25, %v286_v22 }
 0x201   :  { %v289_v29 = vrot.slane %v288_v26, 2 }
 0x203   :  { %v290_v30 = vadd.f32 %v289_v29, %v288_v26  ;;  %v366_v26 = vmul.f32 %v725_v23, %v692_v8  ;;  %v367_v29 = vmul.f32 %v727_v24, %v694_v9 }
 0x205   :  { %v291_v31 = vrot.slane %v290_v30, 1 }
 0x207   :  { %v292_v32 = vadd.f32 %v291_v31, %v290_v30 }
 0x209   :  { %558 = vrcp.f32 %v292_v32 }
 0x213   :  { %v559_v36 = vpop.eup %558 }
 0x214   :  { %v294_v40 = vmul.f32 %v559_v36, %v555_v19  ;;  %v761_v41 = vmul.f32 %v559_v36, %v557_v20 }
 0x216   :  { %v301_v47 = vrot.slane %v294_v40, %v300_v33  ;;  %v311_v48 = vrot.slane %v294_v40, %v310_v34  ;;  %v321_v50 = vrot.slane %v294_v40, %v320_v35  ;;  %v331_v54 = vrot.slane %v294_v40, %v330_v37 }
 0x217   :  { %v341_v62 = vrot.slane %v294_v40, %v340_v45  ;;  %v351_v6 = vrot.slane %v294_v40, %v350_v51  ;;  %v361_v19 = vrot.slane %v294_v40, %v360_v59  ;;  %v371_v30 = vrot.slane %v294_v40, %v370_v3 }
 0x218   :  { %v302_v55 = vmul.f32 %v301_v47, %v296_v38  ;;  %v303_v56 = vmul.f32 %v301_v47, %v297_v39  ;;  %v312_v57 = vmul.f32 %v311_v48, %v306_v42  ;;  %v313_v58 = vmul.f32 %v311_v48, %v307_v44 }
 0x219   :  { %v322_v1 = vmul.f32 %v321_v50, %v316_v46  ;;  %v323_v2 = vmul.f32 %v321_v50, %v317_v49  ;;  %v332_v15 = vmul.f32 %v331_v54, %v326_v52  ;;  %v333_v16 = vmul.f32 %v331_v54, %v327_v53 }
 0x21a   :  { %v314_v63 = vadd.f32 %v312_v57, %v302_v55  ;;  %v315_v0 = vadd.f32 %v313_v58, %v303_v56  ;;  %v342_v22 = vmul.f32 %v341_v62, %v336_v60  ;;  %v343_v25 = vmul.f32 %v341_v62, %v337_v61 }
 0x21b   :  { %v352_v36 = vmul.f32 %v351_v6, %v346_v4  ;;  %v353_v38 = vmul.f32 %v351_v6, %v347_v5  ;;  %v362_v39 = vmul.f32 %v361_v19, %v356_v17  ;;  %v376_v42 = vmul.f32 %v731_v27, %v692_v8 }
 0x21c   :  { %v324_v10 = vadd.f32 %v322_v1, %v314_v63  ;;  %v325_v7 = vadd.f32 %v323_v2, %v315_v0  ;;  %v377_v44 = vmul.f32 %v733_v28, %v694_v9  ;;  %v363_v48 = vmul.f32 %v361_v19, %v357_v18 }
 0x21d   :  { %v381_v49 = vrot.slane %v761_v41, %v300_v33  ;;  %v372_v50 = vmul.f32 %v371_v30, %v366_v26  ;;  %v386_v40 = vmul.f32 %v703_v13, %v699_v11  ;;  %v387_v52 = vmul.f32 %v705_v14, %v701_v12 }
 0x21e   :  { %v334_v20 = vadd.f32 %v332_v15, %v324_v10  ;;  %v335_v21 = vadd.f32 %v333_v16, %v325_v7  ;;  %v373_v55 = vmul.f32 %v371_v30, %v367_v29  ;;  %v391_v8 = vrot.slane %v761_v41, %v310_v34 }
 0x21f   :  { %v396_v9 = vmul.f32 %v725_v23, %v699_v11  ;;  %v397_v33 = vmul.f32 %v727_v24, %v701_v12  ;;  %v401_v56 = vrot.slane %v761_v41, %v320_v35  ;;  %v382_v60 = vmul.f32 %v381_v49, %v376_v42  ;;  %v451_v42 = vpop.permute.xlu0 %450 }
 0x220   :  { %v344_v31 = vadd.f32 %v342_v22, %v334_v20  ;;  %v345_v32 = vadd.f32 %v343_v25, %v335_v21  ;;  %v383_v61 = vmul.f32 %v381_v49, %v377_v44  ;;  %v406_v62 = vmul.f32 %v731_v27, %v699_v11 }
 0x221   :  { %v407_v34 = vmul.f32 %v733_v28, %v701_v12  ;;  %v411_v63 = vrot.slane %v761_v41, %v330_v37  ;;  %v392_v2 = vmul.f32 %v391_v8, %v386_v40  ;;  %v393_v3 = vmul.f32 %v391_v8, %v387_v52 }
 0x222   :  { %v354_v46 = vadd.f32 %v352_v36, %v344_v31  ;;  %v355_v47 = vadd.f32 %v353_v38, %v345_v32  ;;  %v416_v35 = vmul.f32 %v725_v23, %v703_v13  ;;  %v417_v4 = vmul.f32 %v727_v24, %v705_v14 }
 0x223   :  { %v421_v11 = vrot.slane %v761_v41, %v340_v45  ;;  %v402_v6 = vmul.f32 %v401_v56, %v396_v9  ;;  %v403_v10 = vmul.f32 %v401_v56, %v397_v33  ;;  %v426_v37 = vmul.f32 %v731_v27, %v703_v13 }
 0x224   :  { %v364_v53 = vadd.f32 %v362_v39, %v354_v46  ;;  %v365_v54 = vadd.f32 %v363_v48, %v355_v47  ;;  %v427_v7 = vmul.f32 %v733_v28, %v705_v14  ;;  %v431_v15 = vrot.slane %v761_v41, %v350_v51  ;;  %v456_v39 = vpop.permute.xlu1 %455 }
 0x225   :  { %v412_v18 = vmul.f32 %v411_v63, %v406_v62  ;;  %v413_v19 = vmul.f32 %v411_v63, %v407_v34  ;;  %v422_v20 = vmul.f32 %v421_v11, %v416_v35  ;;  %v436_v45 = vmul.f32 %v731_v27, %v725_v23 }
 0x226   :  { %v374_v57 = vadd.f32 %v372_v50, %v364_v53  ;;  %v375_v58 = vadd.f32 %v373_v55, %v365_v54  ;;  %v437_v21 = vmul.f32 %v733_v28, %v727_v24  ;;  %v423_v25 = vmul.f32 %v421_v11, %v417_v4 }
 0x227   :  { %v441_v14 = vrot.slane %v761_v41, %v360_v59  ;;  %v432_v29 = vmul.f32 %v431_v15, %v426_v37  ;;  %v433_v30 = vmul.f32 %v431_v15, %v427_v7 }
 0x228   :  { %v384_v0 = vadd.f32 %v382_v60, %v374_v57  ;;  %v385_v1 = vadd.f32 %v383_v61, %v375_v58 }
 0x229   :  { %v442_v36 = vmul.f32 %v441_v14, %v436_v45  ;;  %v443_v38 = vmul.f32 %v441_v14, %v437_v21 }
 0x22a   :  { %v394_v5 = vadd.f32 %v392_v2, %v384_v0  ;;  %v395_v12 = vadd.f32 %v393_v3, %v385_v1 }
 0x22c   :  { %v404_v16 = vadd.f32 %v402_v6, %v394_v5  ;;  %v405_v17 = vadd.f32 %v403_v10, %v395_v12 }
 0x22e   :  { %v414_v22 = vadd.f32 %v412_v18, %v404_v16  ;;  %v415_v13 = vadd.f32 %v413_v19, %v405_v17 }
 0x230   :  { %v424_v26 = vadd.f32 %v422_v20, %v414_v22  ;;  %v425_v51 = vadd.f32 %v423_v25, %v415_v13 }
 0x232   :  { %v434_v31 = vadd.f32 %v432_v29, %v424_v26  ;;  %v435_v32 = vadd.f32 %v433_v30, %v425_v51 }
 0x234   :  { %v444_v23 = vadd.f32 %v442_v36, %v434_v31  ;;  %v445_v27 = vadd.f32 %v443_v38, %v435_v32 }
 0x236   :  { %v458_v24 = vmul.f32 %v451_v42, %v444_v23  ;;  %v459_v28 = vmul.f32 %v456_v39, %v445_v27 }
 0x238   :  { %v460_v44 = vadd.f32 %v459_v28, %v458_v24 }
 0x23a   :  { %v461_v46 = vrot.slane %v460_v44, 4 }
 0x23c   :  { %v462_v47 = vadd.f32 %v461_v46, %v460_v44 }
 0x23e   :  { %v463_v43 = vrot.slane %v462_v47, 2 }
 0x240   :  { %v464_v48 = vadd.f32 %v463_v43, %v462_v47 }
 0x242   :  { %v465_v41 = vrot.slane %v464_v48, 1 }
 0x244   :  { %v466_v59 = vadd.f32 %v465_v41, %v464_v48 }
 0x246   :  { %467 = vst [vmem:[#allocation5] sm:$0x1] %v466_v59 }
 0x247   :  { %593 = shalt.err (!%p590_p12)
}
 0x248   :  { %s594_s28 = scalar_lea.hbm %s871_s5, 16 }
 0x249   :  { %p595_p13 = scmp.ne.s32.totalorder %s871_s5, %s594_s28  ;;  %p598_p0 = scmp.lt.u32.totalorder %s594_s28, %s871_s5 }
 0x24b   :  { %p600_p1 = pnand %p598_p0, %p595_p13 }
 0x24d   :  { %603 = shalt.err (!%p600_p1)
}
 0x24e   :  { %477 = dma.vmem_to_hbm [thread:$0]  %s475_s4, 16, %s871_s5, [#allocation4]  }
 0x24f   :  { %606 = dma.done.wait [#allocation4], 16  }
 0x250   :  { %607 = vsyncadd [#allocation4], 4294967280 }
 0x251   :  { %481 = vsyncpa [#allocation3], 1 }
 0x252   :  { %482 = vsyncpa [#allocation4], 1 }

</bundles_post_ra>
